<compile_context>
chip_gen: v7x
topology: tpu7x:2x2x1
jax: 0.10.0
libtpu: 0.0.40
codegen_flags: <defaults>
</compile_context>

<pallas_src>
import jax
import jax.numpy as jnp
from jax.experimental import pallas as pl
from jax.experimental.pallas import tpu as pltpu


def _double_kernel(x_ref, o_ref):
    # blocks(x) + shortcut(x); both Identity -> x + x (single HBM read).
    x = x_ref[...]
    o_ref[...] = x + x


# Lane-dense candidates (multiples of 128 -> unmasked vector stores, long DMAs).
_LANE_CANDIDATES = (2048, 1024, 512, 256, 128)
# Below this, pallas_call launch overhead dominates; XLA's fused add wins.
_SMALL_INPUT_ELEMS = 256 * 1024


def _chip_kind():
    try:
        return jax.devices()[0].device_kind.lower()
    except Exception:
        return ""


def residual_block_forward(x, in_channels, out_channels, donate_input=False):
    """JAX/Pallas equivalent of ResidualBlock.forward for NCHW input x.

    Note: in this module both `blocks` and `shortcut` are nn.Identity, so the
    result is x + x (== 2*x) whether or not in_channels == out_channels.
    """
    assert x.shape[1] == in_channels
    del out_channels  # Identity shortcut either way -> result is always 2*x.

    orig_shape = x.shape
    total = 1
    for d in orig_shape:
        total *= int(d)

    # Small-input fast path: a fused XLA add is strictly faster at this size.
    if total < _SMALL_INPUT_ELEMS:
        return x + x

    # Pick the widest lane count that divides the element count so the slab
    # reshape is layout-free (no pad, no post-slice).
    cols = None
    for c in _LANE_CANDIDATES:
        if total % c == 0:
            cols = c
            break
    if cols is None:
        # Exotic size with no 128-multiple divisor: this op is HBM-bound, so a
        # plain fused add already sits at the roofline.
        return x + x

    rows = total // cols
    itemsize = jnp.dtype(x.dtype).itemsize
    # Sublane packing: 8 rows (f32), 16 (bf16), 32 (int8/fp8).
    sublane = 8 * max(1, 4 // itemsize)

    kind = _chip_kind()
    if "v5" in kind:
        # v5e: 2 MiB tiles -> ~8 MiB peak (in+out, double-buffered), inside
        # the 16 MiB scoped-VMEM default; bigger tiles buy only ~3-5% here.
        tile_bytes = 2 << 20
        vmem_limit = None
    else:
        # v6e / v7x (and unknown): 4 MiB tiles amortize the ~0.35 us per-step
        # overhead; ~16 MiB peak, raise the scoped limit explicitly (safe on
        # v7x's 64 MiB physical VMEM).
        tile_bytes = 4 << 20
        vmem_limit = 32 << 20

    tile_rows = max(sublane, (tile_bytes // (cols * itemsize)) // sublane * sublane)
    # Keep >= 2 grid steps so "parallel" can shard across both v7x TensorCores.
    half = -(-rows // 2)
    half = -(-half // sublane) * sublane
    tile_rows = min(tile_rows, half)
    tile_rows = min(tile_rows, -(-rows // sublane) * sublane)

    grid = (pl.cdiv(rows, tile_rows),)

    # Layout-free reshape to a lane-dense slab.  If rows % tile_rows != 0 the
    # last row-block is partial and Pallas masks its loads/stores.
    slab = x.reshape(rows, cols)

    call_kwargs = {}
    if donate_input:
        # Write the result back into x's HBM buffer (caller must not reuse x).
        call_kwargs["input_output_aliases"] = {0: 0}

    out_slab = pl.pallas_call(
        _double_kernel,
        out_shape=jax.ShapeDtypeStruct((rows, cols), x.dtype),
        grid=grid,
        in_specs=[pl.BlockSpec((tile_rows, cols), lambda i: (i, 0))],
        out_specs=pl.BlockSpec((tile_rows, cols), lambda i: (i, 0)),
        compiler_params=pltpu.CompilerParams(
            # Fully data-parallel: lets Mosaic shard grid steps across both
            # TensorCores on v7x; harmless on v5e/v6e.
            dimension_semantics=("parallel",),
            vmem_limit_bytes=vmem_limit,
        ),
        **call_kwargs,
    )(slab)

    return out_slab.reshape(orig_shape)


if __name__ == "__main__":
    # Larger input (2*64*56*56 = 401408 elems > 256K) exercises the Pallas path.
    key = jax.random.PRNGKey(0)
    N, C, H, W = 2, 64, 56, 56
    x = jax.random.normal(key, (N, C, H, W), dtype=jnp.float32)

    out = residual_block_forward(x, in_channels=C, out_channels=C)
    out = jax.block_until_ready(out)

    expected = x + x
    assert out.shape == x.shape
    assert out.dtype == x.dtype
    assert jnp.allclose(out, expected, atol=1e-6, rtol=1e-6)

    # Small shape consistent with the module demo: takes the plain-JAX fast
    # path (Pallas launch cost would dominate at 2048 elements).
    xs = jax.random.normal(jax.random.PRNGKey(0), (2, 4, 16, 16), dtype=jnp.float32)
    outs = jax.block_until_ready(residual_block_forward(xs, in_channels=4, out_channels=4))
    assert outs.shape == xs.shape and outs.dtype == xs.dtype
    assert jnp.allclose(outs, xs + xs, atol=1e-6, rtol=1e-6)

    print("KERNEL_OK")
</pallas_src>

<mosaic_0001>
module attributes {stable_mosaic.version = 11 : i64} {
  func.func @_double_kernel(%arg0: i32, %arg1: memref<104x2048xf32, #tpu.memory_space<vmem>>, %arg2: memref<104x2048xf32, #tpu.memory_space<vmem>>) attributes {dimension_semantics = [#tpu.dimension_semantics<parallel>], iteration_bounds = array<i64: 2>, scalar_prefetch = 0 : i64, scratch_operands = 0 : i64, tpu.core_type = #tpu.core_type<tc>, window_params = [{transform_indices = @transform_0, window_bounds = array<i64: 104, 2048>}, {transform_indices = @transform_1, window_bounds = array<i64: 104, 2048>}]} {
    %c0 = arith.constant 0 : index
    %c0_0 = arith.constant 0 : index
    %0 = vector.load %arg1[%c0, %c0_0] : memref<104x2048xf32, #tpu.memory_space<vmem>>, vector<104x2048xf32>
    %1 = arith.addf %0, %0 : vector<104x2048xf32>
    %c0_1 = arith.constant 0 : index
    %c0_2 = arith.constant 0 : index
    %2 = vector.load %arg2[%c0_1, %c0_2] : memref<104x2048xf32, #tpu.memory_space<vmem>>, vector<104x2048xf32>
    tpu.vector_store %arg2[%c0_1, %c0_2], %1 {strides = array<i32>} : memref<104x2048xf32, #tpu.memory_space<vmem>>, vector<104x2048xf32>,
    return
  }
  func.func @transform_0(%arg0: i32) -> (i32, i32) {
    %c0_i32 = arith.constant 0 : i32
    %c0_i32_0 = arith.constant 0 : i32
    return %arg0, %c0_i32 : i32, i32
  }
  func.func @transform_1(%arg0: i32) -> (i32, i32) {
    %c0_i32 = arith.constant 0 : i32
    %c0_i32_0 = arith.constant 0 : i32
    return %arg0, %c0_i32 : i32, i32
  }
}

</mosaic_0001>

<bundles_post_ra>
// kernel: tpu_custom_call.1
= control target key start
LH: loop header
LB: loop body
LE: loop exit
PB: predicated region body
PF: predicated region fallthrough
CT: control target
= control target key end

     0   :  { %6 = vsyncpa [#allocation3], 0  ;;  %s1650_s0 = inlined_call_operand.hbm [shape: f32[196,2048], index: 0, kind: input, shape index: {}]   ;;  %s1651_s1 = inlined_call_operand.hbm [shape: f32[196,2048], index: 1, kind: output, shape index: {}]  }
   0x1   :  { %8 = vsyncpa [#allocation3 + $0x1], 0 }
   0x2   :  { %9 = vsyncpa [#allocation4], 0 }
   0x3   :  { %11 = vsyncpa [#allocation4 + $0x1], 0  ;;  %s1059_s6 = smov 0   ;;  %s1061_s7 = smov 0  }
   0x4   :  { %s1063_s8 = smov 0   ;;  %s1065_s9 = smov 0  }
   0x5 LB: > { %s1080_s10 = sadd.s32 4294967295, %s1041_s9   ;;  %s874_s11 = sadd.s32 4294967294, %s1041_s9   ;;  %s1041_s9 = sphi %s1065_s9, %s1661_s9   ;;  %s1037_s8 = sphi %s1063_s8, %s1660_s8   ;;  %s1033_s7 = sphi %s1061_s7, %s1659_s7   ;;  %s1029_s6 = sphi %s1059_s6, %s1658_s6  }
   0x6   : > { %s1084_s12 = sadd.s32 1, %s1041_s9   ;;  %s24_s13 = sadd.s32 1, %s1037_s8 }
   0x7   : > { %s21_s14 = ssub.s32 %s1041_s9, %s1084_s12  ;;  %p31_p0 = scmp.ne.s32.totalorder %s1037_s8, %s1033_s7 }
   0x8   : > { %p22_p1 = scmp.eq.s32.totalorder %s21_s14, 0  ;;  %p32_p2 = scmp.eq.s32.totalorder %s1041_s9, 0 }
   0x9   : > { %p37_p3 = scmp.ne.s32.totalorder %s1033_s7, %s1029_s6  ;;  %p38_p4 = scmp.eq.s32.totalorder %s1080_s10, 0 }
   0xa   : > { %s1096_s15 = scalar_select %p22_p1, %s1037_s8, %s24_s13  }
   0xb   : > { %p33_p5 = por %p32_p2, %p31_p0  ;;  %p1098_p6 = por %p38_p4, %p37_p3 }
   0xc   : > { %p61_p7 = scmp.eq.s32.totalorder %s1080_s10, 1  ;;  %p67_p8 = scmp.eq.s32.totalorder %s874_s11, 1 }
   0xd   : > { %p1652_p11 = scmp.ge.s32.totalorder %s1041_s9, 2 }
   0xe   : > { %p1103_p9 = por %p61_p7, %p31_p0  ;;  %p1107_p10 = por %p67_p8, %p37_p3 }
   0xf   : > { %83 = sbr.rel (%p1652_p11) target bundleno = 57 (0x39), region = 16 }
  0x10   : > { %s1655_s18 = scalar_select %p1107_p10, 1, 0 }
  0x16   : > { %86 = sbr.rel (!%p33_p5) target bundleno = 57 (0x39), region = 20  ;;  %s87_s19 = sand.u32 (%p33_p5), 1, %s1037_s8  }
  0x17   : > { %s92_s20 = smul.u32 (%p33_p5), 13, %s1041_s9  ;;  %s1119_s25 = scalar_lea.sflag (%p33_p5), [#allocation3], %s87_s19 }
  0x18   : > { %s902_s21 = smul.u32 (%p33_p5), 1664, %s87_s19 }
  0x19   : > { %s93_s22 = ssub.s32 (%p33_p5), 25, %s92_s20 }
  0x1a   : > { %p94_p12 = scmp.lt.s32.totalorder (%p33_p5), %s93_s22, 13  ;;  %s91_s26 = scalar_lea.vmem (%p33_p5), [#allocation2], %s902_s21 }
  0x1d   : > { %s1663_s22 = smov (!%p94_p12, %s93_s22), 13 }
  0x1e   : > { %s1116_s23 = sshll.u32 %s1663_s22, 11 }
  0x1f   : > { %s99_s24 = ssub.s32 26624, %s1116_s23 }
  0x20   : > { %100 = vsyncadd %s1119_s25, %s99_s24  ;;  %p879_p13 = scmp.ne.s32.totalorder %s1116_s23, 0  ;;  %s900_s27 = smul.u32 26624, %s1041_s9 }
  0x21   : > { %s106_s28 = sshll.u32 %s91_s26, 4  ;;  %s951_s11 = scalar_lea.hbm %s1650_s0, 51200  ;;  %s1129_s28 = int_to_ptr.vmem [resolvable:$true] %s106_s28 }
  0x22   : > { %s1127_s2 = scalar_lea.hbm %s1650_s0, %s900_s27 }
  0x23   : > { %s947_s3 = scalar_lea.hbm %s1127_s2, %s1116_s23  ;;  %p952_p3 = scmp.lt.u32.totalorder %s1127_s2, %s1650_s0 }
  0x24   : > { %p948_p0 = scmp.ne.s32.totalorder %s1127_s2, %s947_s3  ;;  %p953_p4 = scmp.lt.u32.totalorder %s951_s11, %s947_s3 }
  0x25   : > { %p955_p7 = scmp.lt.u32.totalorder %s947_s3, %s1127_s2 }
  0x26   : > { %p949_p1 = pnand %p948_p0, %p879_p13  ;;  %p954_p5 = por %p953_p4, %p952_p3 }
  0x28   : > { %p950_p2 = pneg %p949_p1  ;;  %p956_p8 = por %p955_p7, %p954_p5 }
  0x2a   : > { %p957_p12 = pnand %p956_p8, %p950_p2 }
  0x2c   : > { %960 = shalt.err (!%p957_p12)
}
  0x2d   : > { %s961_s19 = scalar_lea.vmem %s1129_s28, %s1116_s23  ;;  %s1043_s20 = smov [#allocation2]  }
  0x2e   : > { %p962_p0 = scmp.ne.s32.totalorder %s1129_s28, %s961_s19  ;;  %s965_s21 = sshll.u32 %s1043_s20, 4  ;;  %s966_s21 = int_to_ptr.vmem [resolvable:$false] %s965_s21 }
  0x2f   : > { %s967_s22 = scalar_lea.vmem %s966_s21, 53248  ;;  %p968_p10 = scmp.lt.s32.totalorder %s1129_s28, %s966_s21 }
  0x30   : > { %p963_p1 = pnand %p962_p0, %p879_p13  ;;  %p969_p3 = scmp.lt.s32.totalorder %s967_s22, %s961_s19 }
  0x32   : > { %p964_p11 = pneg %p963_p1  ;;  %p970_p4 = por %p969_p3, %p968_p10 }
  0x34   : > { %p971_p5 = pnand %p970_p4, %p964_p11 }
  0x36   : > { %974 = shalt.err (!%p971_p5)
}
  0x37   : > { %s1044_s24 = smov 2048   ;;  %s1045_s26 = smov 128  }
  0x38   : > { %112 = dma.hbm_to_vmem [thread:$0]  (%p879_p13), %s1127_s2, %s1116_s23, %s1129_s28, %s1119_s25, %s1044_s24, %s1044_s24, %s1045_s26  }
  0x39 PF: > { %p884_p2 = scmp.ge.s32.totalorder %s1041_s9, 1  ;;  %p114_p7 = scmp.lt.s32.totalorder %s1041_s9, 3 }
  0x3b   : > { %p115_p8 = pnand %p884_p2, %p114_p7 }
  0x3c   : > { %s1159_s27 = sand.u32 (!%p115_p8), 1, %s1033_s7  }
  0x3d   : > { %118 = sbr.rel (%p115_p8) target bundleno = 204 (0xcc), region = 24  ;;  %s121_s30 = scalar_lea.sflag (!%p115_p8), [#allocation3], %s1159_s27 }
  0x3e   : > { %s903_s29 = smul.u32 (!%p115_p8), 1664, %s1159_s27 }
  0x40   : > { %s1163_s3 = scalar_lea.vmem (!%p115_p8), [#allocation2], %s903_s29 }
  0x44   : > { %1020 = dma.done.wait (%p1098_p6), %s121_s30, 26624  }
  0x45   : > { %1022 = vsyncadd (%p1098_p6), %s121_s30, 4294940672  ;;  %v155_v0 = vld [vmem:[%s1163_s3] sm:$0xff]  ;;  %v156_v1 = vld [vmem:[%s1163_s3 + $0x8] sm:$0xff]  ;;  %s1178_s16 = scalar_lea.vmem [#allocation5], %s903_s29  ;;  %s780_s23 = scalar_lea.sflag [#allocation4], %s1159_s27 }
  0x46   : > { %v157_v2 = vld [vmem:[%s1163_s3 + $0x10] sm:$0xff]  ;;  %v363_v3 = vadd.f32 %v155_v0, %v155_v0  ;;  %v364_v4 = vadd.f32 %v156_v1, %v156_v1  ;;  %v158_v6 = vld [vmem:[%s1163_s3 + $0x18] sm:$0xff]  ;;  %v159_v7 = vld [vmem:[%s1163_s3 + $0x20] sm:$0xff]  ;;  %s787_s25 = smul.u32 (%p1103_p9), 13, %s1080_s10 }
  0x47   : > { %v365_v5 = vadd.f32 %v157_v2, %v157_v2  ;;  %v160_v8 = vld [vmem:[%s1163_s3 + $0x28] sm:$0xff]  ;;  %v366_v9 = vadd.f32 %v158_v6, %v158_v6  ;;  %v367_v10 = vadd.f32 %v159_v7, %v159_v7  ;;  %v161_v12 = vld [vmem:[%s1163_s3 + $0x30] sm:$0xff]  ;;  %v162_v13 = vld [vmem:[%s1163_s3 + $0x38] sm:$0xff] }
  0x48   : > { %v368_v11 = vadd.f32 %v160_v8, %v160_v8  ;;  %v163_v14 = vld [vmem:[%s1163_s3 + $0x40] sm:$0xff]  ;;  %571 = vst [vmem:[%s1178_s16] sm:$0xff] %v363_v3  ;;  %572 = vst [vmem:[%s1178_s16 + $0x8] sm:$0xff] %v364_v4  ;;  %v369_v15 = vadd.f32 %v161_v12, %v161_v12  ;;  %v370_v16 = vadd.f32 %v162_v13, %v162_v13  ;;  %v164_v18 = vld [vmem:[%s1163_s3 + $0x48] sm:$0xff]  ;;  %s788_s28 = ssub.s32 (%p1103_p9), 25, %s787_s25 }
  0x49   : > { %573 = vst [vmem:[%s1178_s16 + $0x10] sm:$0xff] %v365_v5  ;;  %v371_v17 = vadd.f32 %v163_v14, %v163_v14  ;;  %v165_v19 = vld [vmem:[%s1163_s3 + $0x50] sm:$0xff]  ;;  %v166_v20 = vld [vmem:[%s1163_s3 + $0x58] sm:$0xff]  ;;  %574 = vst [vmem:[%s1178_s16 + $0x18] sm:$0xff] %v366_v9  ;;  %v372_v21 = vadd.f32 %v164_v18, %v164_v18  ;;  %p789_p6 = scmp.lt.s32.totalorder (%p1103_p9), %s788_s28, 13 }
  0x4a   : > { %575 = vst [vmem:[%s1178_s16 + $0x20] sm:$0xff] %v367_v10  ;;  %576 = vst [vmem:[%s1178_s16 + $0x28] sm:$0xff] %v368_v11  ;;  %v373_v22 = vadd.f32 %v165_v19, %v165_v19  ;;  %v374_v23 = vadd.f32 %v166_v20, %v166_v20  ;;  %v167_v24 = vld [vmem:[%s1163_s3 + $0x60] sm:$0xff]  ;;  %v168_v25 = vld [vmem:[%s1163_s3 + $0x68] sm:$0xff] }
  0x4b   : > { %v169_v26 = vld [vmem:[%s1163_s3 + $0x70] sm:$0xff]  ;;  %577 = vst [vmem:[%s1178_s16 + $0x30] sm:$0xff] %v369_v15  ;;  %578 = vst [vmem:[%s1178_s16 + $0x38] sm:$0xff] %v370_v16  ;;  %v375_v27 = vadd.f32 %v167_v24, %v167_v24  ;;  %v376_v28 = vadd.f32 %v168_v25, %v168_v25  ;;  %v170_v30 = vld [vmem:[%s1163_s3 + $0x78] sm:$0xff] }
  0x4c   : > { %579 = vst [vmem:[%s1178_s16 + $0x40] sm:$0xff] %v371_v17  ;;  %v377_v29 = vadd.f32 %v169_v26, %v169_v26  ;;  %v171_v31 = vld [vmem:[%s1163_s3 + $0x80] sm:$0xff]  ;;  %v172_v32 = vld [vmem:[%s1163_s3 + $0x88] sm:$0xff]  ;;  %580 = vst [vmem:[%s1178_s16 + $0x48] sm:$0xff] %v372_v21  ;;  %v378_v33 = vadd.f32 %v170_v30, %v170_v30 }
  0x4d   : > { %581 = vst [vmem:[%s1178_s16 + $0x50] sm:$0xff] %v373_v22  ;;  %582 = vst [vmem:[%s1178_s16 + $0x58] sm:$0xff] %v374_v23  ;;  %v379_v34 = vadd.f32 %v171_v31, %v171_v31  ;;  %v380_v35 = vadd.f32 %v172_v32, %v172_v32  ;;  %v173_v36 = vld [vmem:[%s1163_s3 + $0x90] sm:$0xff]  ;;  %v174_v37 = vld [vmem:[%s1163_s3 + $0x98] sm:$0xff] }
  0x4e   : > { %v175_v38 = vld [vmem:[%s1163_s3 + $0xa0] sm:$0xff]  ;;  %583 = vst [vmem:[%s1178_s16 + $0x60] sm:$0xff] %v375_v27  ;;  %584 = vst [vmem:[%s1178_s16 + $0x68] sm:$0xff] %v376_v28  ;;  %v381_v39 = vadd.f32 %v173_v36, %v173_v36  ;;  %v382_v40 = vadd.f32 %v174_v37, %v174_v37  ;;  %v176_v42 = vld [vmem:[%s1163_s3 + $0xa8] sm:$0xff] }
  0x4f   : > { %585 = vst [vmem:[%s1178_s16 + $0x70] sm:$0xff] %v377_v29  ;;  %v383_v41 = vadd.f32 %v175_v38, %v175_v38  ;;  %v177_v43 = vld [vmem:[%s1163_s3 + $0xb0] sm:$0xff]  ;;  %v178_v44 = vld [vmem:[%s1163_s3 + $0xb8] sm:$0xff]  ;;  %586 = vst [vmem:[%s1178_s16 + $0x78] sm:$0xff] %v378_v33  ;;  %v384_v45 = vadd.f32 %v176_v42, %v176_v42 }
  0x50   : > { %587 = vst [vmem:[%s1178_s16 + $0x80] sm:$0xff] %v379_v34  ;;  %588 = vst [vmem:[%s1178_s16 + $0x88] sm:$0xff] %v380_v35  ;;  %v385_v46 = vadd.f32 %v177_v43, %v177_v43  ;;  %v386_v47 = vadd.f32 %v178_v44, %v178_v44  ;;  %v179_v48 = vld [vmem:[%s1163_s3 + $0xc0] sm:$0xff]  ;;  %v180_v49 = vld [vmem:[%s1163_s3 + $0xc8] sm:$0xff] }
  0x51   : > { %v181_v50 = vld [vmem:[%s1163_s3 + $0xd0] sm:$0xff]  ;;  %589 = vst [vmem:[%s1178_s16 + $0x90] sm:$0xff] %v381_v39  ;;  %590 = vst [vmem:[%s1178_s16 + $0x98] sm:$0xff] %v382_v40  ;;  %v387_v51 = vadd.f32 %v179_v48, %v179_v48  ;;  %v388_v52 = vadd.f32 %v180_v49, %v180_v49  ;;  %v182_v54 = vld [vmem:[%s1163_s3 + $0xd8] sm:$0xff] }
  0x52   : > { %591 = vst [vmem:[%s1178_s16 + $0xa0] sm:$0xff] %v383_v41  ;;  %v389_v53 = vadd.f32 %v181_v50, %v181_v50  ;;  %v183_v55 = vld [vmem:[%s1163_s3 + $0xe0] sm:$0xff]  ;;  %v184_v56 = vld [vmem:[%s1163_s3 + $0xe8] sm:$0xff]  ;;  %592 = vst [vmem:[%s1178_s16 + $0xa8] sm:$0xff] %v384_v45  ;;  %v390_v57 = vadd.f32 %v182_v54, %v182_v54 }
  0x53   : > { %593 = vst [vmem:[%s1178_s16 + $0xb0] sm:$0xff] %v385_v46  ;;  %594 = vst [vmem:[%s1178_s16 + $0xb8] sm:$0xff] %v386_v47  ;;  %v391_v58 = vadd.f32 %v183_v55, %v183_v55  ;;  %v392_v59 = vadd.f32 %v184_v56, %v184_v56  ;;  %v185_v60 = vld [vmem:[%s1163_s3 + $0xf0] sm:$0xff]  ;;  %v186_v61 = vld [vmem:[%s1163_s3 + $0xf8] sm:$0xff] }
  0x54   : > { %v187_v62 = vld [vmem:[%s1163_s3 + $0x100] sm:$0xff]  ;;  %595 = vst [vmem:[%s1178_s16 + $0xc0] sm:$0xff] %v387_v51  ;;  %596 = vst [vmem:[%s1178_s16 + $0xc8] sm:$0xff] %v388_v52  ;;  %v393_v63 = vadd.f32 %v185_v60, %v185_v60  ;;  %v394_v0 = vadd.f32 %v186_v61, %v186_v61  ;;  %v188_v2 = vld [vmem:[%s1163_s3 + $0x108] sm:$0xff] }
  0x55   : > { %597 = vst [vmem:[%s1178_s16 + $0xd0] sm:$0xff] %v389_v53  ;;  %v395_v1 = vadd.f32 %v187_v62, %v187_v62  ;;  %v189_v3 = vld [vmem:[%s1163_s3 + $0x110] sm:$0xff]  ;;  %v190_v4 = vld [vmem:[%s1163_s3 + $0x118] sm:$0xff]  ;;  %598 = vst [vmem:[%s1178_s16 + $0xd8] sm:$0xff] %v390_v57  ;;  %v396_v5 = vadd.f32 %v188_v2, %v188_v2 }
  0x56   : > { %599 = vst [vmem:[%s1178_s16 + $0xe0] sm:$0xff] %v391_v58  ;;  %600 = vst [vmem:[%s1178_s16 + $0xe8] sm:$0xff] %v392_v59  ;;  %v397_v6 = vadd.f32 %v189_v3, %v189_v3  ;;  %v398_v7 = vadd.f32 %v190_v4, %v190_v4  ;;  %v191_v8 = vld [vmem:[%s1163_s3 + $0x120] sm:$0xff]  ;;  %v192_v9 = vld [vmem:[%s1163_s3 + $0x128] sm:$0xff] }
  0x57   : > { %v193_v10 = vld [vmem:[%s1163_s3 + $0x130] sm:$0xff]  ;;  %601 = vst [vmem:[%s1178_s16 + $0xf0] sm:$0xff] %v393_v63  ;;  %602 = vst [vmem:[%s1178_s16 + $0xf8] sm:$0xff] %v394_v0  ;;  %v399_v11 = vadd.f32 %v191_v8, %v191_v8  ;;  %v400_v12 = vadd.f32 %v192_v9, %v192_v9  ;;  %v194_v14 = vld [vmem:[%s1163_s3 + $0x138] sm:$0xff] }
  0x58   : > { %603 = vst [vmem:[%s1178_s16 + $0x100] sm:$0xff] %v395_v1  ;;  %v401_v13 = vadd.f32 %v193_v10, %v193_v10  ;;  %v195_v15 = vld [vmem:[%s1163_s3 + $0x140] sm:$0xff]  ;;  %v196_v16 = vld [vmem:[%s1163_s3 + $0x148] sm:$0xff]  ;;  %604 = vst [vmem:[%s1178_s16 + $0x108] sm:$0xff] %v396_v5  ;;  %v402_v17 = vadd.f32 %v194_v14, %v194_v14 }
  0x59   : > { %605 = vst [vmem:[%s1178_s16 + $0x110] sm:$0xff] %v397_v6  ;;  %606 = vst [vmem:[%s1178_s16 + $0x118] sm:$0xff] %v398_v7  ;;  %v403_v18 = vadd.f32 %v195_v15, %v195_v15  ;;  %v404_v19 = vadd.f32 %v196_v16, %v196_v16  ;;  %v197_v20 = vld [vmem:[%s1163_s3 + $0x150] sm:$0xff]  ;;  %v198_v21 = vld [vmem:[%s1163_s3 + $0x158] sm:$0xff] }
  0x5a   : > { %v199_v22 = vld [vmem:[%s1163_s3 + $0x160] sm:$0xff]  ;;  %607 = vst [vmem:[%s1178_s16 + $0x120] sm:$0xff] %v399_v11  ;;  %608 = vst [vmem:[%s1178_s16 + $0x128] sm:$0xff] %v400_v12  ;;  %v405_v23 = vadd.f32 %v197_v20, %v197_v20  ;;  %v406_v24 = vadd.f32 %v198_v21, %v198_v21  ;;  %v200_v26 = vld [vmem:[%s1163_s3 + $0x168] sm:$0xff] }
  0x5b   : > { %609 = vst [vmem:[%s1178_s16 + $0x130] sm:$0xff] %v401_v13  ;;  %v407_v25 = vadd.f32 %v199_v22, %v199_v22  ;;  %v201_v27 = vld [vmem:[%s1163_s3 + $0x170] sm:$0xff]  ;;  %v202_v28 = vld [vmem:[%s1163_s3 + $0x178] sm:$0xff]  ;;  %610 = vst [vmem:[%s1178_s16 + $0x138] sm:$0xff] %v402_v17  ;;  %v408_v29 = vadd.f32 %v200_v26, %v200_v26 }
  0x5c   : > { %611 = vst [vmem:[%s1178_s16 + $0x140] sm:$0xff] %v403_v18  ;;  %612 = vst [vmem:[%s1178_s16 + $0x148] sm:$0xff] %v404_v19  ;;  %v409_v30 = vadd.f32 %v201_v27, %v201_v27  ;;  %v410_v31 = vadd.f32 %v202_v28, %v202_v28  ;;  %v203_v32 = vld [vmem:[%s1163_s3 + $0x180] sm:$0xff]  ;;  %v204_v33 = vld [vmem:[%s1163_s3 + $0x188] sm:$0xff] }
  0x5d   : > { %v205_v34 = vld [vmem:[%s1163_s3 + $0x190] sm:$0xff]  ;;  %613 = vst [vmem:[%s1178_s16 + $0x150] sm:$0xff] %v405_v23  ;;  %614 = vst [vmem:[%s1178_s16 + $0x158] sm:$0xff] %v406_v24  ;;  %v411_v35 = vadd.f32 %v203_v32, %v203_v32  ;;  %v412_v36 = vadd.f32 %v204_v33, %v204_v33  ;;  %v206_v38 = vld [vmem:[%s1163_s3 + $0x198] sm:$0xff] }
  0x5e   : > { %615 = vst [vmem:[%s1178_s16 + $0x160] sm:$0xff] %v407_v25  ;;  %v413_v37 = vadd.f32 %v205_v34, %v205_v34  ;;  %v207_v39 = vld [vmem:[%s1163_s3 + $0x1a0] sm:$0xff]  ;;  %v208_v40 = vld [vmem:[%s1163_s3 + $0x1a8] sm:$0xff]  ;;  %616 = vst [vmem:[%s1178_s16 + $0x168] sm:$0xff] %v408_v29  ;;  %v414_v41 = vadd.f32 %v206_v38, %v206_v38 }
  0x5f   : > { %617 = vst [vmem:[%s1178_s16 + $0x170] sm:$0xff] %v409_v30  ;;  %618 = vst [vmem:[%s1178_s16 + $0x178] sm:$0xff] %v410_v31  ;;  %v415_v42 = vadd.f32 %v207_v39, %v207_v39  ;;  %v416_v43 = vadd.f32 %v208_v40, %v208_v40  ;;  %v209_v44 = vld [vmem:[%s1163_s3 + $0x1b0] sm:$0xff]  ;;  %v210_v45 = vld [vmem:[%s1163_s3 + $0x1b8] sm:$0xff] }
  0x60   : > { %v211_v46 = vld [vmem:[%s1163_s3 + $0x1c0] sm:$0xff]  ;;  %619 = vst [vmem:[%s1178_s16 + $0x180] sm:$0xff] %v411_v35  ;;  %620 = vst [vmem:[%s1178_s16 + $0x188] sm:$0xff] %v412_v36  ;;  %v417_v47 = vadd.f32 %v209_v44, %v209_v44  ;;  %v418_v48 = vadd.f32 %v210_v45, %v210_v45  ;;  %v212_v50 = vld [vmem:[%s1163_s3 + $0x1c8] sm:$0xff] }
  0x61   : > { %621 = vst [vmem:[%s1178_s16 + $0x190] sm:$0xff] %v413_v37  ;;  %v419_v49 = vadd.f32 %v211_v46, %v211_v46  ;;  %v213_v51 = vld [vmem:[%s1163_s3 + $0x1d0] sm:$0xff]  ;;  %v214_v52 = vld [vmem:[%s1163_s3 + $0x1d8] sm:$0xff]  ;;  %622 = vst [vmem:[%s1178_s16 + $0x198] sm:$0xff] %v414_v41  ;;  %v420_v53 = vadd.f32 %v212_v50, %v212_v50 }
  0x62   : > { %623 = vst [vmem:[%s1178_s16 + $0x1a0] sm:$0xff] %v415_v42  ;;  %624 = vst [vmem:[%s1178_s16 + $0x1a8] sm:$0xff] %v416_v43  ;;  %v421_v54 = vadd.f32 %v213_v51, %v213_v51  ;;  %v422_v55 = vadd.f32 %v214_v52, %v214_v52  ;;  %v215_v56 = vld [vmem:[%s1163_s3 + $0x1e0] sm:$0xff]  ;;  %v216_v57 = vld [vmem:[%s1163_s3 + $0x1e8] sm:$0xff] }
  0x63   : > { %v217_v58 = vld [vmem:[%s1163_s3 + $0x1f0] sm:$0xff]  ;;  %625 = vst [vmem:[%s1178_s16 + $0x1b0] sm:$0xff] %v417_v47  ;;  %626 = vst [vmem:[%s1178_s16 + $0x1b8] sm:$0xff] %v418_v48  ;;  %v423_v59 = vadd.f32 %v215_v56, %v215_v56  ;;  %v424_v60 = vadd.f32 %v216_v57, %v216_v57  ;;  %v218_v62 = vld [vmem:[%s1163_s3 + $0x1f8] sm:$0xff] }
  0x64   : > { %627 = vst [vmem:[%s1178_s16 + $0x1c0] sm:$0xff] %v419_v49  ;;  %v425_v61 = vadd.f32 %v217_v58, %v217_v58  ;;  %v219_v63 = vld [vmem:[%s1163_s3 + $0x200] sm:$0xff]  ;;  %v220_v0 = vld [vmem:[%s1163_s3 + $0x208] sm:$0xff]  ;;  %628 = vst [vmem:[%s1178_s16 + $0x1c8] sm:$0xff] %v420_v53  ;;  %v426_v1 = vadd.f32 %v218_v62, %v218_v62 }
  0x65   : > { %629 = vst [vmem:[%s1178_s16 + $0x1d0] sm:$0xff] %v421_v54  ;;  %630 = vst [vmem:[%s1178_s16 + $0x1d8] sm:$0xff] %v422_v55  ;;  %v427_v2 = vadd.f32 %v219_v63, %v219_v63  ;;  %v428_v3 = vadd.f32 %v220_v0, %v220_v0  ;;  %v221_v4 = vld [vmem:[%s1163_s3 + $0x210] sm:$0xff]  ;;  %v222_v5 = vld [vmem:[%s1163_s3 + $0x218] sm:$0xff] }
  0x66   : > { %v223_v6 = vld [vmem:[%s1163_s3 + $0x220] sm:$0xff]  ;;  %631 = vst [vmem:[%s1178_s16 + $0x1e0] sm:$0xff] %v423_v59  ;;  %632 = vst [vmem:[%s1178_s16 + $0x1e8] sm:$0xff] %v424_v60  ;;  %v429_v7 = vadd.f32 %v221_v4, %v221_v4  ;;  %v430_v8 = vadd.f32 %v222_v5, %v222_v5  ;;  %v224_v10 = vld [vmem:[%s1163_s3 + $0x228] sm:$0xff] }
  0x67   : > { %633 = vst [vmem:[%s1178_s16 + $0x1f0] sm:$0xff] %v425_v61  ;;  %v431_v9 = vadd.f32 %v223_v6, %v223_v6  ;;  %v225_v11 = vld [vmem:[%s1163_s3 + $0x230] sm:$0xff]  ;;  %v226_v12 = vld [vmem:[%s1163_s3 + $0x238] sm:$0xff]  ;;  %634 = vst [vmem:[%s1178_s16 + $0x1f8] sm:$0xff] %v426_v1  ;;  %v432_v13 = vadd.f32 %v224_v10, %v224_v10 }
  0x68   : > { %635 = vst [vmem:[%s1178_s16 + $0x200] sm:$0xff] %v427_v2  ;;  %636 = vst [vmem:[%s1178_s16 + $0x208] sm:$0xff] %v428_v3  ;;  %v433_v14 = vadd.f32 %v225_v11, %v225_v11  ;;  %v434_v15 = vadd.f32 %v226_v12, %v226_v12  ;;  %v227_v16 = vld [vmem:[%s1163_s3 + $0x240] sm:$0xff]  ;;  %v228_v17 = vld [vmem:[%s1163_s3 + $0x248] sm:$0xff] }
  0x69   : > { %v229_v18 = vld [vmem:[%s1163_s3 + $0x250] sm:$0xff]  ;;  %637 = vst [vmem:[%s1178_s16 + $0x210] sm:$0xff] %v429_v7  ;;  %638 = vst [vmem:[%s1178_s16 + $0x218] sm:$0xff] %v430_v8  ;;  %v435_v19 = vadd.f32 %v227_v16, %v227_v16  ;;  %v436_v20 = vadd.f32 %v228_v17, %v228_v17  ;;  %v230_v22 = vld [vmem:[%s1163_s3 + $0x258] sm:$0xff] }
  0x6a   : > { %639 = vst [vmem:[%s1178_s16 + $0x220] sm:$0xff] %v431_v9  ;;  %v437_v21 = vadd.f32 %v229_v18, %v229_v18  ;;  %v231_v23 = vld [vmem:[%s1163_s3 + $0x260] sm:$0xff]  ;;  %v232_v24 = vld [vmem:[%s1163_s3 + $0x268] sm:$0xff]  ;;  %640 = vst [vmem:[%s1178_s16 + $0x228] sm:$0xff] %v432_v13  ;;  %v438_v25 = vadd.f32 %v230_v22, %v230_v22 }
  0x6b   : > { %641 = vst [vmem:[%s1178_s16 + $0x230] sm:$0xff] %v433_v14  ;;  %642 = vst [vmem:[%s1178_s16 + $0x238] sm:$0xff] %v434_v15  ;;  %v439_v26 = vadd.f32 %v231_v23, %v231_v23  ;;  %v440_v27 = vadd.f32 %v232_v24, %v232_v24  ;;  %v233_v28 = vld [vmem:[%s1163_s3 + $0x270] sm:$0xff]  ;;  %v234_v29 = vld [vmem:[%s1163_s3 + $0x278] sm:$0xff] }
  0x6c   : > { %v235_v30 = vld [vmem:[%s1163_s3 + $0x280] sm:$0xff]  ;;  %643 = vst [vmem:[%s1178_s16 + $0x240] sm:$0xff] %v435_v19  ;;  %644 = vst [vmem:[%s1178_s16 + $0x248] sm:$0xff] %v436_v20  ;;  %v441_v31 = vadd.f32 %v233_v28, %v233_v28  ;;  %v442_v32 = vadd.f32 %v234_v29, %v234_v29  ;;  %v236_v34 = vld [vmem:[%s1163_s3 + $0x288] sm:$0xff] }
  0x6d   : > { %645 = vst [vmem:[%s1178_s16 + $0x250] sm:$0xff] %v437_v21  ;;  %v443_v33 = vadd.f32 %v235_v30, %v235_v30  ;;  %v237_v35 = vld [vmem:[%s1163_s3 + $0x290] sm:$0xff]  ;;  %v238_v36 = vld [vmem:[%s1163_s3 + $0x298] sm:$0xff]  ;;  %646 = vst [vmem:[%s1178_s16 + $0x258] sm:$0xff] %v438_v25  ;;  %v444_v37 = vadd.f32 %v236_v34, %v236_v34 }
  0x6e   : > { %647 = vst [vmem:[%s1178_s16 + $0x260] sm:$0xff] %v439_v26  ;;  %648 = vst [vmem:[%s1178_s16 + $0x268] sm:$0xff] %v440_v27  ;;  %v445_v38 = vadd.f32 %v237_v35, %v237_v35  ;;  %v446_v39 = vadd.f32 %v238_v36, %v238_v36  ;;  %v239_v40 = vld [vmem:[%s1163_s3 + $0x2a0] sm:$0xff]  ;;  %v240_v41 = vld [vmem:[%s1163_s3 + $0x2a8] sm:$0xff] }
  0x6f   : > { %v241_v42 = vld [vmem:[%s1163_s3 + $0x2b0] sm:$0xff]  ;;  %649 = vst [vmem:[%s1178_s16 + $0x270] sm:$0xff] %v441_v31  ;;  %650 = vst [vmem:[%s1178_s16 + $0x278] sm:$0xff] %v442_v32  ;;  %v447_v43 = vadd.f32 %v239_v40, %v239_v40  ;;  %v448_v44 = vadd.f32 %v240_v41, %v240_v41  ;;  %v242_v46 = vld [vmem:[%s1163_s3 + $0x2b8] sm:$0xff] }
  0x70   : > { %651 = vst [vmem:[%s1178_s16 + $0x280] sm:$0xff] %v443_v33  ;;  %v449_v45 = vadd.f32 %v241_v42, %v241_v42  ;;  %v243_v47 = vld [vmem:[%s1163_s3 + $0x2c0] sm:$0xff]  ;;  %v244_v48 = vld [vmem:[%s1163_s3 + $0x2c8] sm:$0xff]  ;;  %652 = vst [vmem:[%s1178_s16 + $0x288] sm:$0xff] %v444_v37  ;;  %v450_v49 = vadd.f32 %v242_v46, %v242_v46 }
  0x71   : > { %653 = vst [vmem:[%s1178_s16 + $0x290] sm:$0xff] %v445_v38  ;;  %654 = vst [vmem:[%s1178_s16 + $0x298] sm:$0xff] %v446_v39  ;;  %v451_v50 = vadd.f32 %v243_v47, %v243_v47  ;;  %v452_v51 = vadd.f32 %v244_v48, %v244_v48  ;;  %v245_v52 = vld [vmem:[%s1163_s3 + $0x2d0] sm:$0xff]  ;;  %v246_v53 = vld [vmem:[%s1163_s3 + $0x2d8] sm:$0xff] }
  0x72   : > { %v247_v54 = vld [vmem:[%s1163_s3 + $0x2e0] sm:$0xff]  ;;  %655 = vst [vmem:[%s1178_s16 + $0x2a0] sm:$0xff] %v447_v43  ;;  %656 = vst [vmem:[%s1178_s16 + $0x2a8] sm:$0xff] %v448_v44  ;;  %v453_v55 = vadd.f32 %v245_v52, %v245_v52  ;;  %v454_v56 = vadd.f32 %v246_v53, %v246_v53  ;;  %v248_v58 = vld [vmem:[%s1163_s3 + $0x2e8] sm:$0xff] }
  0x73   : > { %657 = vst [vmem:[%s1178_s16 + $0x2b0] sm:$0xff] %v449_v45  ;;  %v455_v57 = vadd.f32 %v247_v54, %v247_v54  ;;  %v249_v59 = vld [vmem:[%s1163_s3 + $0x2f0] sm:$0xff]  ;;  %v250_v60 = vld [vmem:[%s1163_s3 + $0x2f8] sm:$0xff]  ;;  %658 = vst [vmem:[%s1178_s16 + $0x2b8] sm:$0xff] %v450_v49  ;;  %v456_v61 = vadd.f32 %v248_v58, %v248_v58 }
  0x74   : > { %659 = vst [vmem:[%s1178_s16 + $0x2c0] sm:$0xff] %v451_v50  ;;  %660 = vst [vmem:[%s1178_s16 + $0x2c8] sm:$0xff] %v452_v51  ;;  %v457_v62 = vadd.f32 %v249_v59, %v249_v59  ;;  %v458_v63 = vadd.f32 %v250_v60, %v250_v60  ;;  %v251_v0 = vld [vmem:[%s1163_s3 + $0x300] sm:$0xff]  ;;  %v252_v1 = vld [vmem:[%s1163_s3 + $0x308] sm:$0xff] }
  0x75   : > { %v253_v2 = vld [vmem:[%s1163_s3 + $0x310] sm:$0xff]  ;;  %661 = vst [vmem:[%s1178_s16 + $0x2d0] sm:$0xff] %v453_v55  ;;  %662 = vst [vmem:[%s1178_s16 + $0x2d8] sm:$0xff] %v454_v56  ;;  %v459_v3 = vadd.f32 %v251_v0, %v251_v0  ;;  %v460_v4 = vadd.f32 %v252_v1, %v252_v1  ;;  %v254_v6 = vld [vmem:[%s1163_s3 + $0x318] sm:$0xff] }
  0x76   : > { %663 = vst [vmem:[%s1178_s16 + $0x2e0] sm:$0xff] %v455_v57  ;;  %v461_v5 = vadd.f32 %v253_v2, %v253_v2  ;;  %v255_v7 = vld [vmem:[%s1163_s3 + $0x320] sm:$0xff]  ;;  %v256_v8 = vld [vmem:[%s1163_s3 + $0x328] sm:$0xff]  ;;  %664 = vst [vmem:[%s1178_s16 + $0x2e8] sm:$0xff] %v456_v61  ;;  %v462_v9 = vadd.f32 %v254_v6, %v254_v6 }
  0x77   : > { %665 = vst [vmem:[%s1178_s16 + $0x2f0] sm:$0xff] %v457_v62  ;;  %666 = vst [vmem:[%s1178_s16 + $0x2f8] sm:$0xff] %v458_v63  ;;  %v463_v10 = vadd.f32 %v255_v7, %v255_v7  ;;  %v464_v11 = vadd.f32 %v256_v8, %v256_v8  ;;  %v257_v12 = vld [vmem:[%s1163_s3 + $0x330] sm:$0xff]  ;;  %v258_v13 = vld [vmem:[%s1163_s3 + $0x338] sm:$0xff] }
  0x78   : > { %v259_v14 = vld [vmem:[%s1163_s3 + $0x340] sm:$0xff]  ;;  %667 = vst [vmem:[%s1178_s16 + $0x300] sm:$0xff] %v459_v3  ;;  %668 = vst [vmem:[%s1178_s16 + $0x308] sm:$0xff] %v460_v4  ;;  %v465_v15 = vadd.f32 %v257_v12, %v257_v12  ;;  %v466_v16 = vadd.f32 %v258_v13, %v258_v13  ;;  %v260_v18 = vld [vmem:[%s1163_s3 + $0x348] sm:$0xff] }
  0x79   : > { %669 = vst [vmem:[%s1178_s16 + $0x310] sm:$0xff] %v461_v5  ;;  %v467_v17 = vadd.f32 %v259_v14, %v259_v14  ;;  %v261_v19 = vld [vmem:[%s1163_s3 + $0x350] sm:$0xff]  ;;  %v262_v20 = vld [vmem:[%s1163_s3 + $0x358] sm:$0xff]  ;;  %670 = vst [vmem:[%s1178_s16 + $0x318] sm:$0xff] %v462_v9  ;;  %v468_v21 = vadd.f32 %v260_v18, %v260_v18 }
  0x7a   : > { %671 = vst [vmem:[%s1178_s16 + $0x320] sm:$0xff] %v463_v10  ;;  %672 = vst [vmem:[%s1178_s16 + $0x328] sm:$0xff] %v464_v11  ;;  %v469_v22 = vadd.f32 %v261_v19, %v261_v19  ;;  %v470_v23 = vadd.f32 %v262_v20, %v262_v20  ;;  %v263_v24 = vld [vmem:[%s1163_s3 + $0x360] sm:$0xff]  ;;  %v264_v25 = vld [vmem:[%s1163_s3 + $0x368] sm:$0xff] }
  0x7b   : > { %v265_v26 = vld [vmem:[%s1163_s3 + $0x370] sm:$0xff]  ;;  %673 = vst [vmem:[%s1178_s16 + $0x330] sm:$0xff] %v465_v15  ;;  %674 = vst [vmem:[%s1178_s16 + $0x338] sm:$0xff] %v466_v16  ;;  %v471_v27 = vadd.f32 %v263_v24, %v263_v24  ;;  %v472_v28 = vadd.f32 %v264_v25, %v264_v25  ;;  %v266_v30 = vld [vmem:[%s1163_s3 + $0x378] sm:$0xff] }
  0x7c   : > { %675 = vst [vmem:[%s1178_s16 + $0x340] sm:$0xff] %v467_v17  ;;  %v473_v29 = vadd.f32 %v265_v26, %v265_v26  ;;  %v267_v31 = vld [vmem:[%s1163_s3 + $0x380] sm:$0xff]  ;;  %v268_v32 = vld [vmem:[%s1163_s3 + $0x388] sm:$0xff]  ;;  %676 = vst [vmem:[%s1178_s16 + $0x348] sm:$0xff] %v468_v21  ;;  %v474_v33 = vadd.f32 %v266_v30, %v266_v30 }
  0x7d   : > { %677 = vst [vmem:[%s1178_s16 + $0x350] sm:$0xff] %v469_v22  ;;  %678 = vst [vmem:[%s1178_s16 + $0x358] sm:$0xff] %v470_v23  ;;  %v475_v34 = vadd.f32 %v267_v31, %v267_v31  ;;  %v476_v35 = vadd.f32 %v268_v32, %v268_v32  ;;  %v269_v36 = vld [vmem:[%s1163_s3 + $0x390] sm:$0xff]  ;;  %v270_v37 = vld [vmem:[%s1163_s3 + $0x398] sm:$0xff] }
  0x7e   : > { %v271_v38 = vld [vmem:[%s1163_s3 + $0x3a0] sm:$0xff]  ;;  %679 = vst [vmem:[%s1178_s16 + $0x360] sm:$0xff] %v471_v27  ;;  %680 = vst [vmem:[%s1178_s16 + $0x368] sm:$0xff] %v472_v28  ;;  %v477_v39 = vadd.f32 %v269_v36, %v269_v36  ;;  %v478_v40 = vadd.f32 %v270_v37, %v270_v37  ;;  %v272_v42 = vld [vmem:[%s1163_s3 + $0x3a8] sm:$0xff] }
  0x7f   : > { %681 = vst [vmem:[%s1178_s16 + $0x370] sm:$0xff] %v473_v29  ;;  %v479_v41 = vadd.f32 %v271_v38, %v271_v38  ;;  %v273_v43 = vld [vmem:[%s1163_s3 + $0x3b0] sm:$0xff]  ;;  %v274_v44 = vld [vmem:[%s1163_s3 + $0x3b8] sm:$0xff]  ;;  %682 = vst [vmem:[%s1178_s16 + $0x378] sm:$0xff] %v474_v33  ;;  %v480_v45 = vadd.f32 %v272_v42, %v272_v42 }
  0x80   : > { %683 = vst [vmem:[%s1178_s16 + $0x380] sm:$0xff] %v475_v34  ;;  %684 = vst [vmem:[%s1178_s16 + $0x388] sm:$0xff] %v476_v35  ;;  %v481_v46 = vadd.f32 %v273_v43, %v273_v43  ;;  %v482_v47 = vadd.f32 %v274_v44, %v274_v44  ;;  %v275_v48 = vld [vmem:[%s1163_s3 + $0x3c0] sm:$0xff]  ;;  %v276_v49 = vld [vmem:[%s1163_s3 + $0x3c8] sm:$0xff] }
  0x81   : > { %v277_v50 = vld [vmem:[%s1163_s3 + $0x3d0] sm:$0xff]  ;;  %685 = vst [vmem:[%s1178_s16 + $0x390] sm:$0xff] %v477_v39  ;;  %686 = vst [vmem:[%s1178_s16 + $0x398] sm:$0xff] %v478_v40  ;;  %v483_v51 = vadd.f32 %v275_v48, %v275_v48  ;;  %v484_v52 = vadd.f32 %v276_v49, %v276_v49  ;;  %v278_v54 = vld [vmem:[%s1163_s3 + $0x3d8] sm:$0xff] }
  0x82   : > { %687 = vst [vmem:[%s1178_s16 + $0x3a0] sm:$0xff] %v479_v41  ;;  %v485_v53 = vadd.f32 %v277_v50, %v277_v50  ;;  %v279_v55 = vld [vmem:[%s1163_s3 + $0x3e0] sm:$0xff]  ;;  %v280_v56 = vld [vmem:[%s1163_s3 + $0x3e8] sm:$0xff]  ;;  %688 = vst [vmem:[%s1178_s16 + $0x3a8] sm:$0xff] %v480_v45  ;;  %v486_v57 = vadd.f32 %v278_v54, %v278_v54 }
  0x83   : > { %689 = vst [vmem:[%s1178_s16 + $0x3b0] sm:$0xff] %v481_v46  ;;  %690 = vst [vmem:[%s1178_s16 + $0x3b8] sm:$0xff] %v482_v47  ;;  %v487_v58 = vadd.f32 %v279_v55, %v279_v55  ;;  %v488_v59 = vadd.f32 %v280_v56, %v280_v56  ;;  %v281_v60 = vld [vmem:[%s1163_s3 + $0x3f0] sm:$0xff]  ;;  %v282_v61 = vld [vmem:[%s1163_s3 + $0x3f8] sm:$0xff] }
  0x84   : > { %v283_v62 = vld [vmem:[%s1163_s3 + $0x400] sm:$0xff]  ;;  %691 = vst [vmem:[%s1178_s16 + $0x3c0] sm:$0xff] %v483_v51  ;;  %692 = vst [vmem:[%s1178_s16 + $0x3c8] sm:$0xff] %v484_v52  ;;  %v489_v63 = vadd.f32 %v281_v60, %v281_v60  ;;  %v490_v0 = vadd.f32 %v282_v61, %v282_v61  ;;  %v284_v2 = vld [vmem:[%s1163_s3 + $0x408] sm:$0xff] }
  0x85   : > { %693 = vst [vmem:[%s1178_s16 + $0x3d0] sm:$0xff] %v485_v53  ;;  %v491_v1 = vadd.f32 %v283_v62, %v283_v62  ;;  %v285_v3 = vld [vmem:[%s1163_s3 + $0x410] sm:$0xff]  ;;  %v286_v4 = vld [vmem:[%s1163_s3 + $0x418] sm:$0xff]  ;;  %694 = vst [vmem:[%s1178_s16 + $0x3d8] sm:$0xff] %v486_v57  ;;  %v492_v5 = vadd.f32 %v284_v2, %v284_v2 }
  0x86   : > { %695 = vst [vmem:[%s1178_s16 + $0x3e0] sm:$0xff] %v487_v58  ;;  %696 = vst [vmem:[%s1178_s16 + $0x3e8] sm:$0xff] %v488_v59  ;;  %v493_v6 = vadd.f32 %v285_v3, %v285_v3  ;;  %v494_v7 = vadd.f32 %v286_v4, %v286_v4  ;;  %v287_v8 = vld [vmem:[%s1163_s3 + $0x420] sm:$0xff]  ;;  %v288_v9 = vld [vmem:[%s1163_s3 + $0x428] sm:$0xff] }
  0x87   : > { %v289_v10 = vld [vmem:[%s1163_s3 + $0x430] sm:$0xff]  ;;  %697 = vst [vmem:[%s1178_s16 + $0x3f0] sm:$0xff] %v489_v63  ;;  %698 = vst [vmem:[%s1178_s16 + $0x3f8] sm:$0xff] %v490_v0  ;;  %v495_v11 = vadd.f32 %v287_v8, %v287_v8  ;;  %v496_v12 = vadd.f32 %v288_v9, %v288_v9  ;;  %v290_v14 = vld [vmem:[%s1163_s3 + $0x438] sm:$0xff] }
  0x88   : > { %699 = vst [vmem:[%s1178_s16 + $0x400] sm:$0xff] %v491_v1  ;;  %v497_v13 = vadd.f32 %v289_v10, %v289_v10  ;;  %v291_v15 = vld [vmem:[%s1163_s3 + $0x440] sm:$0xff]  ;;  %v292_v16 = vld [vmem:[%s1163_s3 + $0x448] sm:$0xff]  ;;  %700 = vst [vmem:[%s1178_s16 + $0x408] sm:$0xff] %v492_v5  ;;  %v498_v17 = vadd.f32 %v290_v14, %v290_v14 }
  0x89   : > { %701 = vst [vmem:[%s1178_s16 + $0x410] sm:$0xff] %v493_v6  ;;  %702 = vst [vmem:[%s1178_s16 + $0x418] sm:$0xff] %v494_v7  ;;  %v499_v18 = vadd.f32 %v291_v15, %v291_v15  ;;  %v500_v19 = vadd.f32 %v292_v16, %v292_v16  ;;  %v293_v20 = vld [vmem:[%s1163_s3 + $0x450] sm:$0xff]  ;;  %v294_v21 = vld [vmem:[%s1163_s3 + $0x458] sm:$0xff] }
  0x8a   : > { %v295_v22 = vld [vmem:[%s1163_s3 + $0x460] sm:$0xff]  ;;  %703 = vst [vmem:[%s1178_s16 + $0x420] sm:$0xff] %v495_v11  ;;  %704 = vst [vmem:[%s1178_s16 + $0x428] sm:$0xff] %v496_v12  ;;  %v501_v23 = vadd.f32 %v293_v20, %v293_v20  ;;  %v502_v24 = vadd.f32 %v294_v21, %v294_v21  ;;  %v296_v26 = vld [vmem:[%s1163_s3 + $0x468] sm:$0xff] }
  0x8b   : > { %705 = vst [vmem:[%s1178_s16 + $0x430] sm:$0xff] %v497_v13  ;;  %v503_v25 = vadd.f32 %v295_v22, %v295_v22  ;;  %v297_v27 = vld [vmem:[%s1163_s3 + $0x470] sm:$0xff]  ;;  %v298_v28 = vld [vmem:[%s1163_s3 + $0x478] sm:$0xff]  ;;  %706 = vst [vmem:[%s1178_s16 + $0x438] sm:$0xff] %v498_v17  ;;  %v504_v29 = vadd.f32 %v296_v26, %v296_v26 }
  0x8c   : > { %707 = vst [vmem:[%s1178_s16 + $0x440] sm:$0xff] %v499_v18  ;;  %708 = vst [vmem:[%s1178_s16 + $0x448] sm:$0xff] %v500_v19  ;;  %v505_v30 = vadd.f32 %v297_v27, %v297_v27  ;;  %v506_v31 = vadd.f32 %v298_v28, %v298_v28  ;;  %v299_v32 = vld [vmem:[%s1163_s3 + $0x480] sm:$0xff]  ;;  %v300_v33 = vld [vmem:[%s1163_s3 + $0x488] sm:$0xff] }
  0x8d   : > { %v301_v34 = vld [vmem:[%s1163_s3 + $0x490] sm:$0xff]  ;;  %709 = vst [vmem:[%s1178_s16 + $0x450] sm:$0xff] %v501_v23  ;;  %710 = vst [vmem:[%s1178_s16 + $0x458] sm:$0xff] %v502_v24  ;;  %v507_v35 = vadd.f32 %v299_v32, %v299_v32  ;;  %v508_v36 = vadd.f32 %v300_v33, %v300_v33  ;;  %v302_v38 = vld [vmem:[%s1163_s3 + $0x498] sm:$0xff] }
  0x8e   : > { %711 = vst [vmem:[%s1178_s16 + $0x460] sm:$0xff] %v503_v25  ;;  %v509_v37 = vadd.f32 %v301_v34, %v301_v34  ;;  %v303_v39 = vld [vmem:[%s1163_s3 + $0x4a0] sm:$0xff]  ;;  %v304_v40 = vld [vmem:[%s1163_s3 + $0x4a8] sm:$0xff]  ;;  %712 = vst [vmem:[%s1178_s16 + $0x468] sm:$0xff] %v504_v29  ;;  %v510_v41 = vadd.f32 %v302_v38, %v302_v38 }
  0x8f   : > { %713 = vst [vmem:[%s1178_s16 + $0x470] sm:$0xff] %v505_v30  ;;  %714 = vst [vmem:[%s1178_s16 + $0x478] sm:$0xff] %v506_v31  ;;  %v511_v42 = vadd.f32 %v303_v39, %v303_v39  ;;  %v512_v43 = vadd.f32 %v304_v40, %v304_v40  ;;  %v305_v44 = vld [vmem:[%s1163_s3 + $0x4b0] sm:$0xff]  ;;  %v306_v45 = vld [vmem:[%s1163_s3 + $0x4b8] sm:$0xff] }
  0x90   : > { %v307_v46 = vld [vmem:[%s1163_s3 + $0x4c0] sm:$0xff]  ;;  %715 = vst [vmem:[%s1178_s16 + $0x480] sm:$0xff] %v507_v35  ;;  %716 = vst [vmem:[%s1178_s16 + $0x488] sm:$0xff] %v508_v36  ;;  %v513_v47 = vadd.f32 %v305_v44, %v305_v44  ;;  %v514_v48 = vadd.f32 %v306_v45, %v306_v45  ;;  %v308_v50 = vld [vmem:[%s1163_s3 + $0x4c8] sm:$0xff] }
  0x91   : > { %717 = vst [vmem:[%s1178_s16 + $0x490] sm:$0xff] %v509_v37  ;;  %v515_v49 = vadd.f32 %v307_v46, %v307_v46  ;;  %v309_v51 = vld [vmem:[%s1163_s3 + $0x4d0] sm:$0xff]  ;;  %v310_v52 = vld [vmem:[%s1163_s3 + $0x4d8] sm:$0xff]  ;;  %718 = vst [vmem:[%s1178_s16 + $0x498] sm:$0xff] %v510_v41  ;;  %v516_v53 = vadd.f32 %v308_v50, %v308_v50 }
  0x92   : > { %719 = vst [vmem:[%s1178_s16 + $0x4a0] sm:$0xff] %v511_v42  ;;  %720 = vst [vmem:[%s1178_s16 + $0x4a8] sm:$0xff] %v512_v43  ;;  %v517_v54 = vadd.f32 %v309_v51, %v309_v51  ;;  %v518_v55 = vadd.f32 %v310_v52, %v310_v52  ;;  %v311_v56 = vld [vmem:[%s1163_s3 + $0x4e0] sm:$0xff]  ;;  %v312_v57 = vld [vmem:[%s1163_s3 + $0x4e8] sm:$0xff] }
  0x93   : > { %v313_v58 = vld [vmem:[%s1163_s3 + $0x4f0] sm:$0xff]  ;;  %721 = vst [vmem:[%s1178_s16 + $0x4b0] sm:$0xff] %v513_v47  ;;  %722 = vst [vmem:[%s1178_s16 + $0x4b8] sm:$0xff] %v514_v48  ;;  %v519_v59 = vadd.f32 %v311_v56, %v311_v56  ;;  %v520_v60 = vadd.f32 %v312_v57, %v312_v57  ;;  %v314_v62 = vld [vmem:[%s1163_s3 + $0x4f8] sm:$0xff] }
  0x94   : > { %723 = vst [vmem:[%s1178_s16 + $0x4c0] sm:$0xff] %v515_v49  ;;  %v521_v61 = vadd.f32 %v313_v58, %v313_v58  ;;  %v315_v63 = vld [vmem:[%s1163_s3 + $0x500] sm:$0xff]  ;;  %v316_v0 = vld [vmem:[%s1163_s3 + $0x508] sm:$0xff]  ;;  %724 = vst [vmem:[%s1178_s16 + $0x4c8] sm:$0xff] %v516_v53  ;;  %v522_v1 = vadd.f32 %v314_v62, %v314_v62 }
  0x95   : > { %725 = vst [vmem:[%s1178_s16 + $0x4d0] sm:$0xff] %v517_v54  ;;  %726 = vst [vmem:[%s1178_s16 + $0x4d8] sm:$0xff] %v518_v55  ;;  %v523_v2 = vadd.f32 %v315_v63, %v315_v63  ;;  %v524_v3 = vadd.f32 %v316_v0, %v316_v0  ;;  %v317_v4 = vld [vmem:[%s1163_s3 + $0x510] sm:$0xff]  ;;  %v318_v5 = vld [vmem:[%s1163_s3 + $0x518] sm:$0xff] }
  0x96   : > { %v319_v6 = vld [vmem:[%s1163_s3 + $0x520] sm:$0xff]  ;;  %727 = vst [vmem:[%s1178_s16 + $0x4e0] sm:$0xff] %v519_v59  ;;  %728 = vst [vmem:[%s1178_s16 + $0x4e8] sm:$0xff] %v520_v60  ;;  %v525_v7 = vadd.f32 %v317_v4, %v317_v4  ;;  %v526_v8 = vadd.f32 %v318_v5, %v318_v5  ;;  %v320_v10 = vld [vmem:[%s1163_s3 + $0x528] sm:$0xff] }
  0x97   : > { %729 = vst [vmem:[%s1178_s16 + $0x4f0] sm:$0xff] %v521_v61  ;;  %v527_v9 = vadd.f32 %v319_v6, %v319_v6  ;;  %v321_v11 = vld [vmem:[%s1163_s3 + $0x530] sm:$0xff]  ;;  %v322_v12 = vld [vmem:[%s1163_s3 + $0x538] sm:$0xff]  ;;  %730 = vst [vmem:[%s1178_s16 + $0x4f8] sm:$0xff] %v522_v1  ;;  %v528_v13 = vadd.f32 %v320_v10, %v320_v10 }
  0x98   : > { %731 = vst [vmem:[%s1178_s16 + $0x500] sm:$0xff] %v523_v2  ;;  %732 = vst [vmem:[%s1178_s16 + $0x508] sm:$0xff] %v524_v3  ;;  %v529_v14 = vadd.f32 %v321_v11, %v321_v11  ;;  %v530_v15 = vadd.f32 %v322_v12, %v322_v12  ;;  %v323_v16 = vld [vmem:[%s1163_s3 + $0x540] sm:$0xff]  ;;  %v324_v17 = vld [vmem:[%s1163_s3 + $0x548] sm:$0xff] }
  0x99   : > { %v325_v18 = vld [vmem:[%s1163_s3 + $0x550] sm:$0xff]  ;;  %733 = vst [vmem:[%s1178_s16 + $0x510] sm:$0xff] %v525_v7  ;;  %734 = vst [vmem:[%s1178_s16 + $0x518] sm:$0xff] %v526_v8  ;;  %v531_v19 = vadd.f32 %v323_v16, %v323_v16  ;;  %v532_v20 = vadd.f32 %v324_v17, %v324_v17  ;;  %v326_v22 = vld [vmem:[%s1163_s3 + $0x558] sm:$0xff] }
  0x9a   : > { %735 = vst [vmem:[%s1178_s16 + $0x520] sm:$0xff] %v527_v9  ;;  %v533_v21 = vadd.f32 %v325_v18, %v325_v18  ;;  %v327_v23 = vld [vmem:[%s1163_s3 + $0x560] sm:$0xff]  ;;  %v328_v24 = vld [vmem:[%s1163_s3 + $0x568] sm:$0xff]  ;;  %736 = vst [vmem:[%s1178_s16 + $0x528] sm:$0xff] %v528_v13  ;;  %v534_v25 = vadd.f32 %v326_v22, %v326_v22 }
  0x9b   : > { %737 = vst [vmem:[%s1178_s16 + $0x530] sm:$0xff] %v529_v14  ;;  %738 = vst [vmem:[%s1178_s16 + $0x538] sm:$0xff] %v530_v15  ;;  %v535_v26 = vadd.f32 %v327_v23, %v327_v23  ;;  %v536_v27 = vadd.f32 %v328_v24, %v328_v24  ;;  %v329_v28 = vld [vmem:[%s1163_s3 + $0x570] sm:$0xff]  ;;  %v330_v29 = vld [vmem:[%s1163_s3 + $0x578] sm:$0xff] }
  0x9c   : > { %v331_v30 = vld [vmem:[%s1163_s3 + $0x580] sm:$0xff]  ;;  %739 = vst [vmem:[%s1178_s16 + $0x540] sm:$0xff] %v531_v19  ;;  %740 = vst [vmem:[%s1178_s16 + $0x548] sm:$0xff] %v532_v20  ;;  %v537_v31 = vadd.f32 %v329_v28, %v329_v28  ;;  %v538_v32 = vadd.f32 %v330_v29, %v330_v29  ;;  %v332_v34 = vld [vmem:[%s1163_s3 + $0x588] sm:$0xff] }
  0x9d   : > { %741 = vst [vmem:[%s1178_s16 + $0x550] sm:$0xff] %v533_v21  ;;  %v539_v33 = vadd.f32 %v331_v30, %v331_v30  ;;  %v333_v35 = vld [vmem:[%s1163_s3 + $0x590] sm:$0xff]  ;;  %v334_v36 = vld [vmem:[%s1163_s3 + $0x598] sm:$0xff]  ;;  %742 = vst [vmem:[%s1178_s16 + $0x558] sm:$0xff] %v534_v25  ;;  %v540_v37 = vadd.f32 %v332_v34, %v332_v34 }
  0x9e   : > { %743 = vst [vmem:[%s1178_s16 + $0x560] sm:$0xff] %v535_v26  ;;  %744 = vst [vmem:[%s1178_s16 + $0x568] sm:$0xff] %v536_v27  ;;  %v541_v38 = vadd.f32 %v333_v35, %v333_v35  ;;  %v542_v39 = vadd.f32 %v334_v36, %v334_v36  ;;  %v335_v40 = vld [vmem:[%s1163_s3 + $0x5a0] sm:$0xff]  ;;  %v336_v41 = vld [vmem:[%s1163_s3 + $0x5a8] sm:$0xff] }
  0x9f   : > { %v337_v42 = vld [vmem:[%s1163_s3 + $0x5b0] sm:$0xff]  ;;  %745 = vst [vmem:[%s1178_s16 + $0x570] sm:$0xff] %v537_v31  ;;  %746 = vst [vmem:[%s1178_s16 + $0x578] sm:$0xff] %v538_v32  ;;  %v543_v43 = vadd.f32 %v335_v40, %v335_v40  ;;  %v544_v44 = vadd.f32 %v336_v41, %v336_v41  ;;  %v338_v46 = vld [vmem:[%s1163_s3 + $0x5b8] sm:$0xff] }
  0xa0   : > { %747 = vst [vmem:[%s1178_s16 + $0x580] sm:$0xff] %v539_v33  ;;  %v545_v45 = vadd.f32 %v337_v42, %v337_v42  ;;  %v339_v47 = vld [vmem:[%s1163_s3 + $0x5c0] sm:$0xff]  ;;  %v340_v48 = vld [vmem:[%s1163_s3 + $0x5c8] sm:$0xff]  ;;  %748 = vst [vmem:[%s1178_s16 + $0x588] sm:$0xff] %v540_v37  ;;  %v546_v49 = vadd.f32 %v338_v46, %v338_v46 }
  0xa1   : > { %749 = vst [vmem:[%s1178_s16 + $0x590] sm:$0xff] %v541_v38  ;;  %750 = vst [vmem:[%s1178_s16 + $0x598] sm:$0xff] %v542_v39  ;;  %v547_v50 = vadd.f32 %v339_v47, %v339_v47  ;;  %v548_v51 = vadd.f32 %v340_v48, %v340_v48  ;;  %v341_v52 = vld [vmem:[%s1163_s3 + $0x5d0] sm:$0xff]  ;;  %v342_v53 = vld [vmem:[%s1163_s3 + $0x5d8] sm:$0xff] }
  0xa2   : > { %v343_v54 = vld [vmem:[%s1163_s3 + $0x5e0] sm:$0xff]  ;;  %751 = vst [vmem:[%s1178_s16 + $0x5a0] sm:$0xff] %v543_v43  ;;  %752 = vst [vmem:[%s1178_s16 + $0x5a8] sm:$0xff] %v544_v44  ;;  %v549_v55 = vadd.f32 %v341_v52, %v341_v52  ;;  %v550_v56 = vadd.f32 %v342_v53, %v342_v53  ;;  %v344_v58 = vld [vmem:[%s1163_s3 + $0x5e8] sm:$0xff] }
  0xa3   : > { %753 = vst [vmem:[%s1178_s16 + $0x5b0] sm:$0xff] %v545_v45  ;;  %v551_v57 = vadd.f32 %v343_v54, %v343_v54  ;;  %v345_v59 = vld [vmem:[%s1163_s3 + $0x5f0] sm:$0xff]  ;;  %v346_v60 = vld [vmem:[%s1163_s3 + $0x5f8] sm:$0xff]  ;;  %754 = vst [vmem:[%s1178_s16 + $0x5b8] sm:$0xff] %v546_v49  ;;  %v552_v61 = vadd.f32 %v344_v58, %v344_v58 }
  0xa4   : > { %755 = vst [vmem:[%s1178_s16 + $0x5c0] sm:$0xff] %v547_v50  ;;  %756 = vst [vmem:[%s1178_s16 + $0x5c8] sm:$0xff] %v548_v51  ;;  %v553_v62 = vadd.f32 %v345_v59, %v345_v59  ;;  %v554_v63 = vadd.f32 %v346_v60, %v346_v60  ;;  %v347_v0 = vld [vmem:[%s1163_s3 + $0x600] sm:$0xff]  ;;  %v348_v1 = vld [vmem:[%s1163_s3 + $0x608] sm:$0xff] }
  0xa5   : > { %v349_v2 = vld [vmem:[%s1163_s3 + $0x610] sm:$0xff]  ;;  %757 = vst [vmem:[%s1178_s16 + $0x5d0] sm:$0xff] %v549_v55  ;;  %758 = vst [vmem:[%s1178_s16 + $0x5d8] sm:$0xff] %v550_v56  ;;  %v555_v3 = vadd.f32 %v347_v0, %v347_v0  ;;  %v556_v4 = vadd.f32 %v348_v1, %v348_v1  ;;  %v350_v6 = vld [vmem:[%s1163_s3 + $0x618] sm:$0xff] }
  0xa6   : > { %759 = vst [vmem:[%s1178_s16 + $0x5e0] sm:$0xff] %v551_v57  ;;  %v557_v5 = vadd.f32 %v349_v2, %v349_v2  ;;  %v351_v7 = vld [vmem:[%s1163_s3 + $0x620] sm:$0xff]  ;;  %v352_v8 = vld [vmem:[%s1163_s3 + $0x628] sm:$0xff]  ;;  %760 = vst [vmem:[%s1178_s16 + $0x5e8] sm:$0xff] %v552_v61  ;;  %v558_v9 = vadd.f32 %v350_v6, %v350_v6 }
  0xa7   : > { %761 = vst [vmem:[%s1178_s16 + $0x5f0] sm:$0xff] %v553_v62  ;;  %762 = vst [vmem:[%s1178_s16 + $0x5f8] sm:$0xff] %v554_v63  ;;  %v559_v10 = vadd.f32 %v351_v7, %v351_v7  ;;  %v560_v11 = vadd.f32 %v352_v8, %v352_v8  ;;  %v353_v12 = vld [vmem:[%s1163_s3 + $0x630] sm:$0xff]  ;;  %v354_v13 = vld [vmem:[%s1163_s3 + $0x638] sm:$0xff] }
  0xa8   : > { %v355_v14 = vld [vmem:[%s1163_s3 + $0x640] sm:$0xff]  ;;  %763 = vst [vmem:[%s1178_s16 + $0x600] sm:$0xff] %v555_v3  ;;  %764 = vst [vmem:[%s1178_s16 + $0x608] sm:$0xff] %v556_v4  ;;  %v561_v15 = vadd.f32 %v353_v12, %v353_v12  ;;  %v562_v16 = vadd.f32 %v354_v13, %v354_v13  ;;  %v356_v18 = vld [vmem:[%s1163_s3 + $0x648] sm:$0xff] }
  0xa9   : > { %765 = vst [vmem:[%s1178_s16 + $0x610] sm:$0xff] %v557_v5  ;;  %v563_v17 = vadd.f32 %v355_v14, %v355_v14  ;;  %v357_v19 = vld [vmem:[%s1163_s3 + $0x650] sm:$0xff]  ;;  %v358_v20 = vld [vmem:[%s1163_s3 + $0x658] sm:$0xff]  ;;  %766 = vst [vmem:[%s1178_s16 + $0x618] sm:$0xff] %v558_v9  ;;  %v564_v21 = vadd.f32 %v356_v18, %v356_v18  ;;  %786 = sbr.rel (!%p1103_p9) target bundleno = 204 (0xcc), region = 32 }
  0xaa   : > { %767 = vst [vmem:[%s1178_s16 + $0x620] sm:$0xff] %v559_v10  ;;  %768 = vst [vmem:[%s1178_s16 + $0x628] sm:$0xff] %v560_v11  ;;  %v565_v22 = vadd.f32 %v357_v19, %v357_v19  ;;  %v566_v23 = vadd.f32 %v358_v20, %v358_v20  ;;  %v359_v24 = vld [vmem:[%s1163_s3 + $0x660] sm:$0xff]  ;;  %v360_v25 = vld [vmem:[%s1163_s3 + $0x668] sm:$0xff] }
  0xab   : > { %v361_v26 = vld [vmem:[%s1163_s3 + $0x670] sm:$0xff]  ;;  %769 = vst [vmem:[%s1178_s16 + $0x630] sm:$0xff] %v561_v15  ;;  %770 = vst [vmem:[%s1178_s16 + $0x638] sm:$0xff] %v562_v16  ;;  %v567_v27 = vadd.f32 %v359_v24, %v359_v24  ;;  %v568_v28 = vadd.f32 %v360_v25, %v360_v25  ;;  %v362_v30 = vld [vmem:[%s1163_s3 + $0x678] sm:$0xff] }
  0xac   : > { %771 = vst [vmem:[%s1178_s16 + $0x640] sm:$0xff] %v563_v17  ;;  %v569_v29 = vadd.f32 %v361_v26, %v361_v26  ;;  %772 = vst [vmem:[%s1178_s16 + $0x648] sm:$0xff] %v564_v21  ;;  %v570_v31 = vadd.f32 %v362_v30, %v362_v30 }
  0xad   : > { %773 = vst [vmem:[%s1178_s16 + $0x650] sm:$0xff] %v565_v22  ;;  %774 = vst [vmem:[%s1178_s16 + $0x658] sm:$0xff] %v566_v23 }
  0xae   : > { %775 = vst [vmem:[%s1178_s16 + $0x660] sm:$0xff] %v567_v27  ;;  %776 = vst [vmem:[%s1178_s16 + $0x668] sm:$0xff] %v568_v28 }
  0xaf   : > { %777 = vst [vmem:[%s1178_s16 + $0x670] sm:$0xff] %v569_v29  ;;  %778 = vst [vmem:[%s1178_s16 + $0x678] sm:$0xff] %v570_v31 }
  0xb0   : > { %s1665_s28 = smov (!%p789_p6, %s788_s28), 13 }
  0xb1   : > { %s1591_s2 = sshll.u32 %s1665_s28, 11 }
  0xb2   : > { %s794_s4 = ssub.s32 26624, %s1591_s2 }
  0xb3   : > { %795 = vsyncadd %s780_s23, %s794_s4  ;;  %p887_p10 = scmp.ne.s32.totalorder %s1591_s2, 0  ;;  %s901_s17 = smul.u32 26624, %s1080_s10 }
  0xb4   : > { %s801_s5 = sshll.u32 %s1178_s16, 4  ;;  %s1046_s20 = smov [#allocation5]   ;;  %s1604_s5 = int_to_ptr.vmem [resolvable:$true] %s801_s5 }
  0xb5   : > { %s1602_s14 = scalar_lea.hbm %s1651_s1, %s901_s17  ;;  %s975_s19 = scalar_lea.vmem %s1604_s5, %s1591_s2 }
  0xb6   : > { %p976_p9 = scmp.ne.s32.totalorder %s1604_s5, %s975_s19  ;;  %s979_s21 = sshll.u32 %s1046_s20, 4  ;;  %s980_s21 = int_to_ptr.vmem [resolvable:$false] %s979_s21 }
  0xb7   : > { %s981_s10 = scalar_lea.vmem %s980_s21, 53248  ;;  %p982_p12 = scmp.lt.s32.totalorder %s1604_s5, %s980_s21 }
  0xb8   : > { %p977_p11 = pnand %p976_p9, %p887_p10  ;;  %p983_p0 = scmp.lt.s32.totalorder %s981_s10, %s975_s19 }
  0xba   : > { %p978_p13 = pneg %p977_p11  ;;  %p984_p1 = por %p983_p0, %p982_p12 }
  0xbc   : > { %p985_p3 = pnand %p984_p1, %p978_p13 }
  0xbe   : > { %988 = shalt.err (!%p985_p3)
}
  0xbf   : > { %s989_s22 = scalar_lea.hbm %s1602_s14, %s1591_s2  ;;  %s993_s29 = scalar_lea.hbm %s1651_s1, 51200 }
  0xc0   : > { %p990_p4 = scmp.ne.s32.totalorder %s1602_s14, %s989_s22  ;;  %p994_p7 = scmp.lt.u32.totalorder %s1602_s14, %s1651_s1 }
  0xc1   : > { %p995_p8 = scmp.lt.u32.totalorder %s993_s29, %s989_s22  ;;  %p997_p9 = scmp.lt.u32.totalorder %s989_s22, %s1602_s14 }
  0xc2   : > { %p991_p5 = pnand %p990_p4, %p887_p10 }
  0xc3   : > { %p996_p6 = por %p995_p8, %p994_p7 }
  0xc4   : > { %p992_p2 = pneg %p991_p5 }
  0xc5   : > { %p998_p11 = por %p997_p9, %p996_p6 }
  0xc7   : > { %p999_p13 = pnand %p998_p11, %p992_p2 }
  0xc9   : > { %1002 = shalt.err (!%p999_p13)
}
  0xca   : > { %s1047_s16 = smov 2048   ;;  %s1048_s25 = smov 128  }
  0xcb   : > { %807 = dma.vmem_to_hbm [thread:$0]  (%p887_p10), %s1604_s5, %s1591_s2, %s1602_s14, %s780_s23, %s1047_s16, %s1047_s16, %s1048_s25  }
  0xcc PF: > { %s816_s28 = sand.u32 1, %s1029_s6   ;;  %p1656_p12 = scmp.ne.s32.totalorder %s1655_s18, 0 }
  0xcd   : > { %p1657_p0 = scmp.ge.s32.totalorder %s1041_s9, 2  ;;  %s817_s4 = scalar_lea.sflag [#allocation4], %s816_s28 }
  0xcf   : > { %p907_p1 = pnand %p1657_p0, %p1656_p12 }
  0xd1   : > { %1024 = dma.done.wait (!%p907_p1), %s817_s4, 26624  }
  0xd2   : > { %1026 = vsyncadd (!%p907_p1), %s817_s4, 4294940672  ;;  %p14_p3 = scmp.ge.s32.totalorder %s1084_s12, 4   ;;  %s1658_s6 = smov %s1033_s7 }
  0xd3   : > { %s1659_s7 = smov %s1037_s8  ;;  %s1660_s8 = smov %s1096_s15 }
  0xd4   : > { %s1661_s9 = smov %s1084_s12  ;;  %16 = sbr.rel (!%p14_p3) target bundleno = 5 (0x5), region = 69 }
  0xdb   :  { %822 = vsyncpa [#allocation3], 1 }
  0xdc   :  { %824 = vsyncpa [#allocation3 + $0x1], 1 }
  0xdd   :  { %825 = vsyncpa [#allocation4], 1 }
  0xde   :  { %827 = vsyncpa [#allocation4 + $0x1], 1 }

</bundles_post_ra>
